<compile_context>
chip_gen: v7x
topology: tpu7x:2x2x1
jax: 0.10.0
libtpu: 0.0.40
codegen_flags: <defaults>
</compile_context>

<pallas_src>
import functools

import jax
import jax.numpy as jnp
from jax import lax
from jax.experimental import pallas as pl
from jax.experimental.pallas import tpu as pltpu


# ----------------------------------------------------------------------------
# Fused kernel: per batch element, compute qkv -> MHA -> proj entirely in VMEM.
# ----------------------------------------------------------------------------
def _fused_attention_kernel(*refs, num_heads, scale, has_qkv_bias):
    if has_qkv_bias:
        x_ref, w_qkv_ref, b_qkv_ref, w_proj_ref, b_proj_ref, o_ref = refs
    else:
        x_ref, w_qkv_ref, w_proj_ref, b_proj_ref, o_ref = refs
        b_qkv_ref = None

    x = x_ref[...]                                     # (N, C)
    n_tok, dim = x.shape
    hd = dim // num_heads

    # ---- qkv projection on the MXU, f32 accumulation -------------------------
    qkv = jnp.dot(x, w_qkv_ref[...], preferred_element_type=jnp.float32)
    if b_qkv_ref is not None:
        qkv = qkv + b_qkv_ref[...].astype(jnp.float32)
    qkv = qkv.astype(x.dtype)                          # (N, 3C)

    w_proj = w_proj_ref[...]                           # (C, C)

    # ---- attention: all heads in this grid step; fold each head's output
    # ---- directly into the output projection (keeps every store lane-dense).
    out_acc = jnp.zeros((n_tok, dim), jnp.float32)
    for h in range(num_heads):                         # static, unrolled
        q = qkv[:, h * hd:(h + 1) * hd]                          # (N, hd)
        k = qkv[:, dim + h * hd: dim + (h + 1) * hd]             # (N, hd)
        v = qkv[:, 2 * dim + h * hd: 2 * dim + (h + 1) * hd]     # (N, hd)

        # q @ k^T without materializing a transpose (contract the last axes).
        s = lax.dot_general(
            q, k, (((1,), (1,)), ((), ())),
            preferred_element_type=jnp.float32) * scale          # (N, N) f32

        # softmax in f32; reciprocal on the EUP instead of a VALU divide.
        m = jnp.max(s, axis=-1, keepdims=True)
        p = jnp.exp(s - m)
        inv = pl.reciprocal(jnp.sum(p, axis=-1, keepdims=True), approx=True)
        attn = p * inv                                           # (N, N) f32

        o_h = jnp.dot(attn.astype(v.dtype), v,
                      preferred_element_type=jnp.float32)        # (N, hd)

        # concat_h(o_h) @ W_proj  ==  sum_h  o_h @ W_proj[h*hd:(h+1)*hd, :]
        out_acc = out_acc + jnp.dot(
            o_h.astype(w_proj.dtype), w_proj[h * hd:(h + 1) * hd, :],
            preferred_element_type=jnp.float32)

    out = out_acc + b_proj_ref[...].astype(jnp.float32)
    o_ref[...] = out.astype(o_ref.dtype)


# ----------------------------------------------------------------------------
# Wrapper: builds BlockSpecs so no transposes/reshapes are needed outside.
# ----------------------------------------------------------------------------
def attention_forward(x, w_qkv, b_qkv, w_proj, b_proj, *, num_heads):
    """x: (B, N, C); w_qkv: (C, 3C); b_qkv: (3C,) or None; w_proj: (C, C);
    b_proj: (C,). Returns (B, N, C)."""
    B, N, C = x.shape
    assert C % num_heads == 0
    hd = C // num_heads
    scale = hd ** (-0.5)
    has_qkv_bias = b_qkv is not None

    kernel = functools.partial(
        _fused_attention_kernel,
        num_heads=num_heads, scale=scale, has_qkv_bias=has_qkv_bias)

    x_spec = pl.BlockSpec((None, N, C), lambda b: (b, 0, 0))
    w_qkv_spec = pl.BlockSpec((C, 3 * C), lambda b: (0, 0))
    w_proj_spec = pl.BlockSpec((C, C), lambda b: (0, 0))

    in_specs = [x_spec, w_qkv_spec]
    args = [x, w_qkv]
    if has_qkv_bias:
        in_specs.append(pl.BlockSpec((1, 3 * C), lambda b: (0, 0)))
        args.append(b_qkv.reshape(1, 3 * C))
    in_specs.append(w_proj_spec)
    args.append(w_proj)
    in_specs.append(pl.BlockSpec((1, C), lambda b: (0, 0)))
    args.append(b_proj.reshape(1, C))

    return pl.pallas_call(
        kernel,
        out_shape=jax.ShapeDtypeStruct((B, N, C), x.dtype),
        grid=(B,),
        in_specs=in_specs,
        out_specs=pl.BlockSpec((None, N, C), lambda b: (b, 0, 0)),
        compiler_params=pltpu.CompilerParams(
            dimension_semantics=("parallel",)),
    )(*args)


# ----------------------------------------------------------------------------
# Pure-JAX reference (for correctness check only)
# ----------------------------------------------------------------------------
def attention_ref(x, w_qkv, b_qkv, w_proj, b_proj, *, num_heads):
    B, N, C = x.shape
    hd = C // num_heads
    scale = hd ** (-0.5)
    qkv = x @ w_qkv
    if b_qkv is not None:
        qkv = qkv + b_qkv
    qkv = qkv.reshape(B, N, 3, num_heads, hd).transpose(2, 0, 3, 1, 4)
    q, k, v = qkv[0], qkv[1], qkv[2]
    attn = jax.nn.softmax((q @ jnp.swapaxes(k, -2, -1)) * scale, axis=-1)
    o = (attn @ v).transpose(0, 2, 1, 3).reshape(B, N, C)
    return o @ w_proj + b_proj


if __name__ == "__main__":
    B, N, C, H = 2, 8, 32, 8  # dim=32, num_heads=8 -> head_dim=4

    key = jax.random.PRNGKey(0)
    k1, k2, k3, k4, k5 = jax.random.split(key, 5)
    x = jax.random.normal(k1, (B, N, C), jnp.float32)

    # Deterministic synthetic parameters.
    w_qkv = jax.random.normal(k2, (C, 3 * C), jnp.float32) * 0.02
    w_proj = jax.random.normal(k3, (C, C), jnp.float32) * 0.02
    b_proj = jax.random.normal(k4, (C,), jnp.float32) * 0.02

    # Case 1: module config (qkv_bias=False) -> no bias operand at all.
    out = attention_forward(x, w_qkv, None, w_proj, b_proj, num_heads=H)
    out = jax.block_until_ready(out)
    ref = attention_ref(x, w_qkv, None, w_proj, b_proj, num_heads=H)
    assert out.shape == (B, N, C)
    assert jnp.allclose(out, ref, atol=2e-3, rtol=2e-3), (
        f"mismatch vs reference (no qkv bias), "
        f"max abs err {float(jnp.max(jnp.abs(out - ref)))}")

    # Case 2: qkv_bias=True path.
    b_qkv = jax.random.normal(k5, (3 * C,), jnp.float32) * 0.02
    out_b = attention_forward(x, w_qkv, b_qkv, w_proj, b_proj, num_heads=H)
    out_b = jax.block_until_ready(out_b)
    ref_b = attention_ref(x, w_qkv, b_qkv, w_proj, b_proj, num_heads=H)
    assert jnp.allclose(out_b, ref_b, atol=2e-3, rtol=2e-3), (
        f"mismatch vs reference (qkv bias), "
        f"max abs err {float(jnp.max(jnp.abs(out_b - ref_b)))}")

    print("KERNEL_OK")
</pallas_src>

<mosaic_0001>
module attributes {stable_mosaic.version = 11 : i64} {
  func.func @_fused_attention_kernel(%arg0: i32, %arg1: memref<1x8x32xf32, #tpu.memory_space<vmem>>, %arg2: memref<32x96xf32, #tpu.memory_space<vmem>>, %arg3: memref<32x32xf32, #tpu.memory_space<vmem>>, %arg4: memref<1x32xf32, #tpu.memory_space<vmem>>, %arg5: memref<1x8x32xf32, #tpu.memory_space<vmem>>) attributes {dimension_semantics = [#tpu.dimension_semantics<parallel>], iteration_bounds = array<i64: 2>, scalar_prefetch = 0 : i64, scratch_operands = 0 : i64, tpu.core_type = #tpu.core_type<tc>, window_params = [{transform_indices = @transform_0, window_bounds = array<i64: 1, 8, 32>}, {pipeline_mode = #tpu.pipeline_mode<synchronous>, transform_indices = @transform_1, window_bounds = array<i64: 32, 96>}, {pipeline_mode = #tpu.pipeline_mode<synchronous>, transform_indices = @transform_2, window_bounds = array<i64: 32, 32>}, {pipeline_mode = #tpu.pipeline_mode<synchronous>, transform_indices = @transform_3, window_bounds = array<i64: 1, 32>}, {transform_indices = @transform_4, window_bounds = array<i64: 1, 8, 32>}]} {
    %c0 = arith.constant 0 : index
    %c0_0 = arith.constant 0 : index
    %c0_1 = arith.constant 0 : index
    %0 = vector.load %arg1[%c0, %c0_0, %c0_1] : memref<1x8x32xf32, #tpu.memory_space<vmem>>, vector<1x8x32xf32>
    %1 = vector.shape_cast %0 : vector<1x8x32xf32> to vector<8x32xf32>
    %c0_2 = arith.constant 0 : index
    %c0_3 = arith.constant 0 : index
    %2 = vector.load %arg2[%c0_2, %c0_3] : memref<32x96xf32, #tpu.memory_space<vmem>>, vector<32x96xf32>
    %cst = arith.constant dense<0.000000e+00> : vector<8x96xf32>
    %3 = tpu.matmul %1, %2, %cst {dimension_numbers = #tpu.dot_dimension_numbers<[1], [0], [0], [1], [0, 0, 1, 1], [], []>} : vector<8x32xf32>, vector<32x96xf32>, vector<8x96xf32> -> vector<8x96xf32>
    %c0_4 = arith.constant 0 : index
    %c0_5 = arith.constant 0 : index
    %4 = vector.load %arg3[%c0_4, %c0_5] : memref<32x32xf32, #tpu.memory_space<vmem>>, vector<32x32xf32>
    %cst_6 = arith.constant 0.000000e+00 : f32
    %5 = vector.broadcast %cst_6 : f32 to vector<8x32xf32>
    %6 = vector.extract_strided_slice %3 {offsets = [0, 0], sizes = [8, 4], strides = [1, 1]} : vector<8x96xf32> to vector<8x4xf32>
    %7 = vector.extract_strided_slice %3 {offsets = [0, 32], sizes = [8, 4], strides = [1, 1]} : vector<8x96xf32> to vector<8x4xf32>
    %8 = vector.extract_strided_slice %3 {offsets = [0, 64], sizes = [8, 4], strides = [1, 1]} : vector<8x96xf32> to vector<8x4xf32>
    %cst_7 = arith.constant dense<0.000000e+00> : vector<8x8xf32>
    %9 = tpu.matmul %6, %7, %cst_7 {dimension_numbers = #tpu.dot_dimension_numbers<[1], [1], [0], [0], [0, 0, 1, 0], [], []>} : vector<8x4xf32>, vector<8x4xf32>, vector<8x8xf32> -> vector<8x8xf32>
    %cst_8 = arith.constant 5.000000e-01 : f32
    %10 = vector.broadcast %cst_8 : f32 to vector<8x8xf32>
    %11 = arith.mulf %9, %10 : vector<8x8xf32>
    %cst_9 = arith.constant dense<0xFF800000> : vector<8xf32>
    %12 = vector.multi_reduction <maximumf>, %11, %cst_9 [1] : vector<8x8xf32> to vector<8xf32>
    %13 = vector.shape_cast %12 : vector<8xf32> to vector<8x1xf32>
    %14 = vector.broadcast %13 : vector<8x1xf32> to vector<8x8xf32>
    %15 = arith.subf %11, %14 : vector<8x8xf32>
    %16 = math.exp %15 : vector<8x8xf32>
    %cst_10 = arith.constant dense<0.000000e+00> : vector<8xf32>
    %17 = vector.multi_reduction <add>, %16, %cst_10 [1] : vector<8x8xf32> to vector<8xf32>
    %18 = vector.shape_cast %17 : vector<8xf32> to vector<8x1xf32>
    %19 = tpu.reciprocal %18 {approx = true} : vector<8x1xf32> -> vector<8x1xf32>
    %20 = vector.broadcast %19 : vector<8x1xf32> to vector<8x8xf32>
    %21 = arith.mulf %16, %20 : vector<8x8xf32>
    %cst_11 = arith.constant dense<0.000000e+00> : vector<8x4xf32>
    %22 = tpu.matmul %21, %8, %cst_11 {dimension_numbers = #tpu.dot_dimension_numbers<[1], [0], [0], [1], [0, 0, 1, 1], [], []>} : vector<8x8xf32>, vector<8x4xf32>, vector<8x4xf32> -> vector<8x4xf32>
    %23 = vector.extract_strided_slice %4 {offsets = [0, 0], sizes = [4, 32], strides = [1, 1]} : vector<32x32xf32> to vector<4x32xf32>
    %cst_12 = arith.constant dense<0.000000e+00> : vector<8x32xf32>
    %24 = tpu.matmul %22, %23, %cst_12 {dimension_numbers = #tpu.dot_dimension_numbers<[1], [0], [0], [1], [0, 0, 1, 1], [], []>} : vector<8x4xf32>, vector<4x32xf32>, vector<8x32xf32> -> vector<8x32xf32>
    %25 = arith.addf %5, %24 : vector<8x32xf32>
    %26 = vector.extract_strided_slice %3 {offsets = [0, 4], sizes = [8, 4], strides = [1, 1]} : vector<8x96xf32> to vector<8x4xf32>
    %27 = vector.extract_strided_slice %3 {offsets = [0, 36], sizes = [8, 4], strides = [1, 1]} : vector<8x96xf32> to vector<8x4xf32>
    %28 = vector.extract_strided_slice %3 {offsets = [0, 68], sizes = [8, 4], strides = [1, 1]} : vector<8x96xf32> to vector<8x4xf32>
    %cst_13 = arith.constant dense<0.000000e+00> : vector<8x8xf32>
    %29 = tpu.matmul %26, %27, %cst_13 {dimension_numbers = #tpu.dot_dimension_numbers<[1], [1], [0], [0], [0, 0, 1, 0], [], []>} : vector<8x4xf32>, vector<8x4xf32>, vector<8x8xf32> -> vector<8x8xf32>
    %cst_14 = arith.constant 5.000000e-01 : f32
    %30 = vector.broadcast %cst_14 : f32 to vector<8x8xf32>
    %31 = arith.mulf %29, %30 : vector<8x8xf32>
    %cst_15 = arith.constant dense<0xFF800000> : vector<8xf32>
    %32 = vector.multi_reduction <maximumf>, %31, %cst_15 [1] : vector<8x8xf32> to vector<8xf32>
    %33 = vector.shape_cast %32 : vector<8xf32> to vector<8x1xf32>
    %34 = vector.broadcast %33 : vector<8x1xf32> to vector<8x8xf32>
    %35 = arith.subf %31, %34 : vector<8x8xf32>
    %36 = math.exp %35 : vector<8x8xf32>
    %cst_16 = arith.constant dense<0.000000e+00> : vector<8xf32>
    %37 = vector.multi_reduction <add>, %36, %cst_16 [1] : vector<8x8xf32> to vector<8xf32>
    %38 = vector.shape_cast %37 : vector<8xf32> to vector<8x1xf32>
    %39 = tpu.reciprocal %38 {approx = true} : vector<8x1xf32> -> vector<8x1xf32>
    %40 = vector.broadcast %39 : vector<8x1xf32> to vector<8x8xf32>
    %41 = arith.mulf %36, %40 : vector<8x8xf32>
    %cst_17 = arith.constant dense<0.000000e+00> : vector<8x4xf32>
    %42 = tpu.matmul %41, %28, %cst_17 {dimension_numbers = #tpu.dot_dimension_numbers<[1], [0], [0], [1], [0, 0, 1, 1], [], []>} : vector<8x8xf32>, vector<8x4xf32>, vector<8x4xf32> -> vector<8x4xf32>
    %43 = vector.extract_strided_slice %4 {offsets = [4, 0], sizes = [4, 32], strides = [1, 1]} : vector<32x32xf32> to vector<4x32xf32>
    %cst_18 = arith.constant dense<0.000000e+00> : vector<8x32xf32>
    %44 = tpu.matmul %42, %43, %cst_18 {dimension_numbers = #tpu.dot_dimension_numbers<[1], [0], [0], [1], [0, 0, 1, 1], [], []>} : vector<8x4xf32>, vector<4x32xf32>, vector<8x32xf32> -> vector<8x32xf32>
    %45 = arith.addf %25, %44 : vector<8x32xf32>
    %46 = vector.extract_strided_slice %3 {offsets = [0, 8], sizes = [8, 4], strides = [1, 1]} : vector<8x96xf32> to vector<8x4xf32>
    %47 = vector.extract_strided_slice %3 {offsets = [0, 40], sizes = [8, 4], strides = [1, 1]} : vector<8x96xf32> to vector<8x4xf32>
    %48 = vector.extract_strided_slice %3 {offsets = [0, 72], sizes = [8, 4], strides = [1, 1]} : vector<8x96xf32> to vector<8x4xf32>
    %cst_19 = arith.constant dense<0.000000e+00> : vector<8x8xf32>
    %49 = tpu.matmul %46, %47, %cst_19 {dimension_numbers = #tpu.dot_dimension_numbers<[1], [1], [0], [0], [0, 0, 1, 0], [], []>} : vector<8x4xf32>, vector<8x4xf32>, vector<8x8xf32> -> vector<8x8xf32>
    %cst_20 = arith.constant 5.000000e-01 : f32
    %50 = vector.broadcast %cst_20 : f32 to vector<8x8xf32>
    %51 = arith.mulf %49, %50 : vector<8x8xf32>
    %cst_21 = arith.constant dense<0xFF800000> : vector<8xf32>
    %52 = vector.multi_reduction <maximumf>, %51, %cst_21 [1] : vector<8x8xf32> to vector<8xf32>
    %53 = vector.shape_cast %52 : vector<8xf32> to vector<8x1xf32>
    %54 = vector.broadcast %53 : vector<8x1xf32> to vector<8x8xf32>
    %55 = arith.subf %51, %54 : vector<8x8xf32>
    %56 = math.exp %55 : vector<8x8xf32>
    %cst_22 = arith.constant dense<0.000000e+00> : vector<8xf32>
    %57 = vector.multi_reduction <add>, %56, %cst_22 [1] : vector<8x8xf32> to vector<8xf32>
    %58 = vector.shape_cast %57 : vector<8xf32> to vector<8x1xf32>
    %59 = tpu.reciprocal %58 {approx = true} : vector<8x1xf32> -> vector<8x1xf32>
    %60 = vector.broadcast %59 : vector<8x1xf32> to vector<8x8xf32>
    %61 = arith.mulf %56, %60 : vector<8x8xf32>
    %cst_23 = arith.constant dense<0.000000e+00> : vector<8x4xf32>
    %62 = tpu.matmul %61, %48, %cst_23 {dimension_numbers = #tpu.dot_dimension_numbers<[1], [0], [0], [1], [0, 0, 1, 1], [], []>} : vector<8x8xf32>, vector<8x4xf32>, vector<8x4xf32> -> vector<8x4xf32>
    %63 = vector.extract_strided_slice %4 {offsets = [8, 0], sizes = [4, 32], strides = [1, 1]} : vector<32x32xf32> to vector<4x32xf32>
    %cst_24 = arith.constant dense<0.000000e+00> : vector<8x32xf32>
    %64 = tpu.matmul %62, %63, %cst_24 {dimension_numbers = #tpu.dot_dimension_numbers<[1], [0], [0], [1], [0, 0, 1, 1], [], []>} : vector<8x4xf32>, vector<4x32xf32>, vector<8x32xf32> -> vector<8x32xf32>
    %65 = arith.addf %45, %64 : vector<8x32xf32>
    %66 = vector.extract_strided_slice %3 {offsets = [0, 12], sizes = [8, 4], strides = [1, 1]} : vector<8x96xf32> to vector<8x4xf32>
    %67 = vector.extract_strided_slice %3 {offsets = [0, 44], sizes = [8, 4], strides = [1, 1]} : vector<8x96xf32> to vector<8x4xf32>
    %68 = vector.extract_strided_slice %3 {offsets = [0, 76], sizes = [8, 4], strides = [1, 1]} : vector<8x96xf32> to vector<8x4xf32>
    %cst_25 = arith.constant dense<0.000000e+00> : vector<8x8xf32>
    %69 = tpu.matmul %66, %67, %cst_25 {dimension_numbers = #tpu.dot_dimension_numbers<[1], [1], [0], [0], [0, 0, 1, 0], [], []>} : vector<8x4xf32>, vector<8x4xf32>, vector<8x8xf32> -> vector<8x8xf32>
    %cst_26 = arith.constant 5.000000e-01 : f32
    %70 = vector.broadcast %cst_26 : f32 to vector<8x8xf32>
    %71 = arith.mulf %69, %70 : vector<8x8xf32>
    %cst_27 = arith.constant dense<0xFF800000> : vector<8xf32>
    %72 = vector.multi_reduction <maximumf>, %71, %cst_27 [1] : vector<8x8xf32> to vector<8xf32>
    %73 = vector.shape_cast %72 : vector<8xf32> to vector<8x1xf32>
    %74 = vector.broadcast %73 : vector<8x1xf32> to vector<8x8xf32>
    %75 = arith.subf %71, %74 : vector<8x8xf32>
    %76 = math.exp %75 : vector<8x8xf32>
    %cst_28 = arith.constant dense<0.000000e+00> : vector<8xf32>
    %77 = vector.multi_reduction <add>, %76, %cst_28 [1] : vector<8x8xf32> to vector<8xf32>
    %78 = vector.shape_cast %77 : vector<8xf32> to vector<8x1xf32>
    %79 = tpu.reciprocal %78 {approx = true} : vector<8x1xf32> -> vector<8x1xf32>
    %80 = vector.broadcast %79 : vector<8x1xf32> to vector<8x8xf32>
    %81 = arith.mulf %76, %80 : vector<8x8xf32>
    %cst_29 = arith.constant dense<0.000000e+00> : vector<8x4xf32>
    %82 = tpu.matmul %81, %68, %cst_29 {dimension_numbers = #tpu.dot_dimension_numbers<[1], [0], [0], [1], [0, 0, 1, 1], [], []>} : vector<8x8xf32>, vector<8x4xf32>, vector<8x4xf32> -> vector<8x4xf32>
    %83 = vector.extract_strided_slice %4 {offsets = [12, 0], sizes = [4, 32], strides = [1, 1]} : vector<32x32xf32> to vector<4x32xf32>
    %cst_30 = arith.constant dense<0.000000e+00> : vector<8x32xf32>
    %84 = tpu.matmul %82, %83, %cst_30 {dimension_numbers = #tpu.dot_dimension_numbers<[1], [0], [0], [1], [0, 0, 1, 1], [], []>} : vector<8x4xf32>, vector<4x32xf32>, vector<8x32xf32> -> vector<8x32xf32>
    %85 = arith.addf %65, %84 : vector<8x32xf32>
    %86 = vector.extract_strided_slice %3 {offsets = [0, 16], sizes = [8, 4], strides = [1, 1]} : vector<8x96xf32> to vector<8x4xf32>
    %87 = vector.extract_strided_slice %3 {offsets = [0, 48], sizes = [8, 4], strides = [1, 1]} : vector<8x96xf32> to vector<8x4xf32>
    %88 = vector.extract_strided_slice %3 {offsets = [0, 80], sizes = [8, 4], strides = [1, 1]} : vector<8x96xf32> to vector<8x4xf32>
    %cst_31 = arith.constant dense<0.000000e+00> : vector<8x8xf32>
    %89 = tpu.matmul %86, %87, %cst_31 {dimension_numbers = #tpu.dot_dimension_numbers<[1], [1], [0], [0], [0, 0, 1, 0], [], []>} : vector<8x4xf32>, vector<8x4xf32>, vector<8x8xf32> -> vector<8x8xf32>
    %cst_32 = arith.constant 5.000000e-01 : f32
    %90 = vector.broadcast %cst_32 : f32 to vector<8x8xf32>
    %91 = arith.mulf %89, %90 : vector<8x8xf32>
    %cst_33 = arith.constant dense<0xFF800000> : vector<8xf32>
    %92 = vector.multi_reduction <maximumf>, %91, %cst_33 [1] : vector<8x8xf32> to vector<8xf32>
    %93 = vector.shape_cast %92 : vector<8xf32> to vector<8x1xf32>
    %94 = vector.broadcast %93 : vector<8x1xf32> to vector<8x8xf32>
    %95 = arith.subf %91, %94 : vector<8x8xf32>
    %96 = math.exp %95 : vector<8x8xf32>
    %cst_34 = arith.constant dense<0.000000e+00> : vector<8xf32>
    %97 = vector.multi_reduction <add>, %96, %cst_34 [1] : vector<8x8xf32> to vector<8xf32>
    %98 = vector.shape_cast %97 : vector<8xf32> to vector<8x1xf32>
    %99 = tpu.reciprocal %98 {approx = true} : vector<8x1xf32> -> vector<8x1xf32>
    %100 = vector.broadcast %99 : vector<8x1xf32> to vector<8x8xf32>
    %101 = arith.mulf %96, %100 : vector<8x8xf32>
    %cst_35 = arith.constant dense<0.000000e+00> : vector<8x4xf32>
    %102 = tpu.matmul %101, %88, %cst_35 {dimension_numbers = #tpu.dot_dimension_numbers<[1], [0], [0], [1], [0, 0, 1, 1], [], []>} : vector<8x8xf32>, vector<8x4xf32>, vector<8x4xf32> -> vector<8x4xf32>
    %103 = vector.extract_strided_slice %4 {offsets = [16, 0], sizes = [4, 32], strides = [1, 1]} : vector<32x32xf32> to vector<4x32xf32>
    %cst_36 = arith.constant dense<0.000000e+00> : vector<8x32xf32>
    %104 = tpu.matmul %102, %103, %cst_36 {dimension_numbers = #tpu.dot_dimension_numbers<[1], [0], [0], [1], [0, 0, 1, 1], [], []>} : vector<8x4xf32>, vector<4x32xf32>, vector<8x32xf32> -> vector<8x32xf32>
    %105 = arith.addf %85, %104 : vector<8x32xf32>
    %106 = vector.extract_strided_slice %3 {offsets = [0, 20], sizes = [8, 4], strides = [1, 1]} : vector<8x96xf32> to vector<8x4xf32>
    %107 = vector.extract_strided_slice %3 {offsets = [0, 52], sizes = [8, 4], strides = [1, 1]} : vector<8x96xf32> to vector<8x4xf32>
    %108 = vector.extract_strided_slice %3 {offsets = [0, 84], sizes = [8, 4], strides = [1, 1]} : vector<8x96xf32> to vector<8x4xf32>
    %cst_37 = arith.constant dense<0.000000e+00> : vector<8x8xf32>
    %109 = tpu.matmul %106, %107, %cst_37 {dimension_numbers = #tpu.dot_dimension_numbers<[1], [1], [0], [0], [0, 0, 1, 0], [], []>} : vector<8x4xf32>, vector<8x4xf32>, vector<8x8xf32> -> vector<8x8xf32>
    %cst_38 = arith.constant 5.000000e-01 : f32
    %110 = vector.broadcast %cst_38 : f32 to vector<8x8xf32>
    %111 = arith.mulf %109, %110 : vector<8x8xf32>
    %cst_39 = arith.constant dense<0xFF800000> : vector<8xf32>
    %112 = vector.multi_reduction <maximumf>, %111, %cst_39 [1] : vector<8x8xf32> to vector<8xf32>
    %113 = vector.shape_cast %112 : vector<8xf32> to vector<8x1xf32>
    %114 = vector.broadcast %113 : vector<8x1xf32> to vector<8x8xf32>
    %115 = arith.subf %111, %114 : vector<8x8xf32>
    %116 = math.exp %115 : vector<8x8xf32>
    %cst_40 = arith.constant dense<0.000000e+00> : vector<8xf32>
    %117 = vector.multi_reduction <add>, %116, %cst_40 [1] : vector<8x8xf32> to vector<8xf32>
    %118 = vector.shape_cast %117 : vector<8xf32> to vector<8x1xf32>
    %119 = tpu.reciprocal %118 {approx = true} : vector<8x1xf32> -> vector<8x1xf32>
    %120 = vector.broadcast %119 : vector<8x1xf32> to vector<8x8xf32>
    %121 = arith.mulf %116, %120 : vector<8x8xf32>
    %cst_41 = arith.constant dense<0.000000e+00> : vector<8x4xf32>
    %122 = tpu.matmul %121, %108, %cst_41 {dimension_numbers = #tpu.dot_dimension_numbers<[1], [0], [0], [1], [0, 0, 1, 1], [], []>} : vector<8x8xf32>, vector<8x4xf32>, vector<8x4xf32> -> vector<8x4xf32>
    %123 = vector.extract_strided_slice %4 {offsets = [20, 0], sizes = [4, 32], strides = [1, 1]} : vector<32x32xf32> to vector<4x32xf32>
    %cst_42 = arith.constant dense<0.000000e+00> : vector<8x32xf32>
    %124 = tpu.matmul %122, %123, %cst_42 {dimension_numbers = #tpu.dot_dimension_numbers<[1], [0], [0], [1], [0, 0, 1, 1], [], []>} : vector<8x4xf32>, vector<4x32xf32>, vector<8x32xf32> -> vector<8x32xf32>
    %125 = arith.addf %105, %124 : vector<8x32xf32>
    %126 = vector.extract_strided_slice %3 {offsets = [0, 24], sizes = [8, 4], strides = [1, 1]} : vector<8x96xf32> to vector<8x4xf32>
    %127 = vector.extract_strided_slice %3 {offsets = [0, 56], sizes = [8, 4], strides = [1, 1]} : vector<8x96xf32> to vector<8x4xf32>
    %128 = vector.extract_strided_slice %3 {offsets = [0, 88], sizes = [8, 4], strides = [1, 1]} : vector<8x96xf32> to vector<8x4xf32>
    %cst_43 = arith.constant dense<0.000000e+00> : vector<8x8xf32>
    %129 = tpu.matmul %126, %127, %cst_43 {dimension_numbers = #tpu.dot_dimension_numbers<[1], [1], [0], [0], [0, 0, 1, 0], [], []>} : vector<8x4xf32>, vector<8x4xf32>, vector<8x8xf32> -> vector<8x8xf32>
    %cst_44 = arith.constant 5.000000e-01 : f32
    %130 = vector.broadcast %cst_44 : f32 to vector<8x8xf32>
    %131 = arith.mulf %129, %130 : vector<8x8xf32>
    %cst_45 = arith.constant dense<0xFF800000> : vector<8xf32>
    %132 = vector.multi_reduction <maximumf>, %131, %cst_45 [1] : vector<8x8xf32> to vector<8xf32>
    %133 = vector.shape_cast %132 : vector<8xf32> to vector<8x1xf32>
    %134 = vector.broadcast %133 : vector<8x1xf32> to vector<8x8xf32>
    %135 = arith.subf %131, %134 : vector<8x8xf32>
    %136 = math.exp %135 : vector<8x8xf32>
    %cst_46 = arith.constant dense<0.000000e+00> : vector<8xf32>
    %137 = vector.multi_reduction <add>, %136, %cst_46 [1] : vector<8x8xf32> to vector<8xf32>
    %138 = vector.shape_cast %137 : vector<8xf32> to vector<8x1xf32>
    %139 = tpu.reciprocal %138 {approx = true} : vector<8x1xf32> -> vector<8x1xf32>
    %140 = vector.broadcast %139 : vector<8x1xf32> to vector<8x8xf32>
    %141 = arith.mulf %136, %140 : vector<8x8xf32>
    %cst_47 = arith.constant dense<0.000000e+00> : vector<8x4xf32>
    %142 = tpu.matmul %141, %128, %cst_47 {dimension_numbers = #tpu.dot_dimension_numbers<[1], [0], [0], [1], [0, 0, 1, 1], [], []>} : vector<8x8xf32>, vector<8x4xf32>, vector<8x4xf32> -> vector<8x4xf32>
    %143 = vector.extract_strided_slice %4 {offsets = [24, 0], sizes = [4, 32], strides = [1, 1]} : vector<32x32xf32> to vector<4x32xf32>
    %cst_48 = arith.constant dense<0.000000e+00> : vector<8x32xf32>
    %144 = tpu.matmul %142, %143, %cst_48 {dimension_numbers = #tpu.dot_dimension_numbers<[1], [0], [0], [1], [0, 0, 1, 1], [], []>} : vector<8x4xf32>, vector<4x32xf32>, vector<8x32xf32> -> vector<8x32xf32>
    %145 = arith.addf %125, %144 : vector<8x32xf32>
    %146 = vector.extract_strided_slice %3 {offsets = [0, 28], sizes = [8, 4], strides = [1, 1]} : vector<8x96xf32> to vector<8x4xf32>
    %147 = vector.extract_strided_slice %3 {offsets = [0, 60], sizes = [8, 4], strides = [1, 1]} : vector<8x96xf32> to vector<8x4xf32>
    %148 = vector.extract_strided_slice %3 {offsets = [0, 92], sizes = [8, 4], strides = [1, 1]} : vector<8x96xf32> to vector<8x4xf32>
    %cst_49 = arith.constant dense<0.000000e+00> : vector<8x8xf32>
    %149 = tpu.matmul %146, %147, %cst_49 {dimension_numbers = #tpu.dot_dimension_numbers<[1], [1], [0], [0], [0, 0, 1, 0], [], []>} : vector<8x4xf32>, vector<8x4xf32>, vector<8x8xf32> -> vector<8x8xf32>
    %cst_50 = arith.constant 5.000000e-01 : f32
    %150 = vector.broadcast %cst_50 : f32 to vector<8x8xf32>
    %151 = arith.mulf %149, %150 : vector<8x8xf32>
    %cst_51 = arith.constant dense<0xFF800000> : vector<8xf32>
    %152 = vector.multi_reduction <maximumf>, %151, %cst_51 [1] : vector<8x8xf32> to vector<8xf32>
    %153 = vector.shape_cast %152 : vector<8xf32> to vector<8x1xf32>
    %154 = vector.broadcast %153 : vector<8x1xf32> to vector<8x8xf32>
    %155 = arith.subf %151, %154 : vector<8x8xf32>
    %156 = math.exp %155 : vector<8x8xf32>
    %cst_52 = arith.constant dense<0.000000e+00> : vector<8xf32>
    %157 = vector.multi_reduction <add>, %156, %cst_52 [1] : vector<8x8xf32> to vector<8xf32>
    %158 = vector.shape_cast %157 : vector<8xf32> to vector<8x1xf32>
    %159 = tpu.reciprocal %158 {approx = true} : vector<8x1xf32> -> vector<8x1xf32>
    %160 = vector.broadcast %159 : vector<8x1xf32> to vector<8x8xf32>
    %161 = arith.mulf %156, %160 : vector<8x8xf32>
    %cst_53 = arith.constant dense<0.000000e+00> : vector<8x4xf32>
    %162 = tpu.matmul %161, %148, %cst_53 {dimension_numbers = #tpu.dot_dimension_numbers<[1], [0], [0], [1], [0, 0, 1, 1], [], []>} : vector<8x8xf32>, vector<8x4xf32>, vector<8x4xf32> -> vector<8x4xf32>
    %163 = vector.extract_strided_slice %4 {offsets = [28, 0], sizes = [4, 32], strides = [1, 1]} : vector<32x32xf32> to vector<4x32xf32>
    %cst_54 = arith.constant dense<0.000000e+00> : vector<8x32xf32>
    %164 = tpu.matmul %162, %163, %cst_54 {dimension_numbers = #tpu.dot_dimension_numbers<[1], [0], [0], [1], [0, 0, 1, 1], [], []>} : vector<8x4xf32>, vector<4x32xf32>, vector<8x32xf32> -> vector<8x32xf32>
    %165 = arith.addf %145, %164 : vector<8x32xf32>
    %c0_55 = arith.constant 0 : index
    %c0_56 = arith.constant 0 : index
    %166 = vector.load %arg4[%c0_55, %c0_56] : memref<1x32xf32, #tpu.memory_space<vmem>>, vector<1x32xf32>
    %167 = vector.broadcast %166 : vector<1x32xf32> to vector<8x32xf32>
    %168 = arith.addf %165, %167 : vector<8x32xf32>
    %c0_57 = arith.constant 0 : index
    %c0_58 = arith.constant 0 : index
    %c0_59 = arith.constant 0 : index
    %169 = vector.load %arg5[%c0_57, %c0_58, %c0_59] : memref<1x8x32xf32, #tpu.memory_space<vmem>>, vector<1x8x32xf32>
    %170 = vector.shape_cast %169 : vector<1x8x32xf32> to vector<8x32xf32>
    %171 = vector.shape_cast %168 : vector<8x32xf32> to vector<1x8x32xf32>
    tpu.vector_store %arg5[%c0_57, %c0_58, %c0_59], %171 {strides = array<i32>} : memref<1x8x32xf32, #tpu.memory_space<vmem>>, vector<1x8x32xf32>,
    return
  }
  func.func @transform_0(%arg0: i32) -> (i32, i32, i32) {
    %c0_i32 = arith.constant 0 : i32
    %c0_i32_0 = arith.constant 0 : i32
    %c0_i32_1 = arith.constant 0 : i32
    return %arg0, %c0_i32, %c0_i32_0 : i32, i32, i32
  }
  func.func @transform_1(%arg0: i32) -> (i32, i32) {
    %c0_i32 = arith.constant 0 : i32
    %c0_i32_0 = arith.constant 0 : i32
    %c0_i32_1 = arith.constant 0 : i32
    return %c0_i32, %c0_i32_0 : i32, i32
  }
  func.func @transform_2(%arg0: i32) -> (i32, i32) {
    %c0_i32 = arith.constant 0 : i32
    %c0_i32_0 = arith.constant 0 : i32
    %c0_i32_1 = arith.constant 0 : i32
    return %c0_i32, %c0_i32_0 : i32, i32
  }
  func.func @transform_3(%arg0: i32) -> (i32, i32) {
    %c0_i32 = arith.constant 0 : i32
    %c0_i32_0 = arith.constant 0 : i32
    %c0_i32_1 = arith.constant 0 : i32
    return %c0_i32, %c0_i32_0 : i32, i32
  }
  func.func @transform_4(%arg0: i32) -> (i32, i32, i32) {
    %c0_i32 = arith.constant 0 : i32
    %c0_i32_0 = arith.constant 0 : i32
    %c0_i32_1 = arith.constant 0 : i32
    return %arg0, %c0_i32, %c0_i32_0 : i32, i32, i32
  }
}

</mosaic_0001>

<bundles_post_ra>
// kernel: tpu_custom_call.1
= control target key start
LH: loop header
LB: loop body
LE: loop exit
PB: predicated region body
PF: predicated region fallthrough
CT: control target
= control target key end

     0   :  { %9 = vsyncpa [#allocation3], 0  ;;  %s3368_s0 = inlined_call_operand.hbm [shape: f32[2,8,32], index: 0, kind: input, shape index: {}]   ;;  %s3369_s1 = inlined_call_operand.hbm [shape: f32[32,96], index: 1, kind: input, shape index: {}]   ;;  %s3370_s2 = inlined_call_operand.hbm [shape: f32[32,32], index: 2, kind: input, shape index: {}]   ;;  %s3371_s3 = inlined_call_operand.vmem [shape: f32[1,32], index: 3, kind: input, shape index: {}]   ;;  %s3372_s4 = inlined_call_operand.hbm [shape: f32[2,8,32], index: 4, kind: output, shape index: {}]  }
   0x1   :  { %11 = vsyncpa [#allocation3 + $0x1], 0 }
   0x2   :  { %12 = vsyncpa [#allocation6], 0 }
   0x3   :  { %13 = vsyncpa [#allocation4], 0 }
   0x4   :  { %15 = vsyncpa [#allocation4 + $0x1], 0  ;;  %s2971_s15 = smov 0   ;;  %s2973_s16 = smov 0  }
   0x5   :  { %s2975_s17 = smov 0   ;;  %s2977_s18 = smov 0  }
   0x6 LB: > { %s2992_s19 = sadd.s32 4294967295, %s2912_s18   ;;  %s2381_s20 = sadd.s32 4294967294, %s2912_s18   ;;  %s2912_s18 = sphi %s2977_s18, %s3392_s18   ;;  %s2908_s17 = sphi %s2975_s17, %s3391_s17   ;;  %s2904_s16 = sphi %s2973_s16, %s3390_s16   ;;  %s2900_s15 = sphi %s2971_s15, %s3389_s15  }
   0x7   : > { %p41_p0 = scmp.ne.s32.totalorder %s2904_s16, %s2900_s15  ;;  %p3373_p1 = scmp.eq.s32.totalorder %s2992_s19, 0 }
   0x8   : > { %p134_p3 = scmp.eq.s32.totalorder %s2381_s20, 1  ;;  %p2382_p5 = scmp.ge.s32.totalorder %s2912_s18, 1 }
   0x9   : > { %p3001_p4 = por %p3373_p1, %p41_p0  ;;  %p141_p7 = scmp.lt.s32.totalorder %s2912_s18, 3 }
   0xa   : > { %p3006_p6 = por %p134_p3, %p41_p0  ;;  %s2914_s24 = smov [#allocation5]  }
   0xb   : > { %s3376_s21 = scalar_select %p3001_p4, 1, 0 }
   0xc   : > { %s3377_s22 = scalar_select %p3006_p6, 1, 0 }
   0xd   : > { %p3011_p8 = pnand %p2382_p5, %p141_p7  ;;  %s153_s25 = sshll.u32 %s2914_s24, 4  ;;  %s3015_s25 = int_to_ptr.vmem [resolvable:$true] %s153_s25 }
   0xe   : > { %s2915_s27 = smov [#allocation7]   ;;  %s2756_s5 = scalar_lea.hbm %s3369_s1, 512 }
   0xf   : > { %p2641_p9 = pneg %p3011_p8  ;;  %s166_s28 = sshll.u32 %s2915_s27, 4  ;;  %s3026_s28 = int_to_ptr.vmem [resolvable:$true] %s166_s28 }
  0x10   : > { %p2757_p12 = scmp.ne.s32.totalorder %s3369_s1, %s2756_s5  ;;  %p2763_p5 = scmp.lt.u32.totalorder %s2756_s5, %s3369_s1 }
  0x11   : > { %p3022_p11 = pnand %p2641_p9, %p3373_p1 }
  0x13   : > { %p2758_p13 = pneg %p3022_p11 }
  0x15   : > { %p2759_p0 = pnand %p2758_p13, %p2757_p12 }
  0x17   : > { %p2760_p3 = pneg %p2759_p0 }
  0x19   : > { %p2765_p7 = pnand %p2763_p5, %p2760_p3 }
  0x1b   : > { %2768 = shalt.err (!%p2765_p7)
}
  0x1c   : > { %s2769_s10 = scalar_lea.vmem %s3015_s25, 512  ;;  %p2777_p2 = scmp.lt.s32.totalorder %s3015_s25, %s3015_s25 }
  0x1d   : > { %p2770_p9 = scmp.ne.s32.totalorder %s3015_s25, %s2769_s10  ;;  %p2778_p12 = scmp.lt.s32.totalorder %s2769_s10, %s2769_s10 }
  0x1f   : > { %p2772_p10 = pnand %p2770_p9, %p2758_p13  ;;  %p2779_p0 = por %p2778_p12, %p2777_p2 }
  0x21   : > { %p2773_p1 = pneg %p2772_p10 }
  0x23   : > { %p2780_p6 = pnand %p2779_p0, %p2773_p1 }
  0x25   : > { %2783 = shalt.err (!%p2780_p6)
}
  0x26   : > { %s2916_s11 = smov 128   ;;  %s2917_s12 = smov 8  }
  0x27   : > { %2644 = dma.hbm_to_vmem [thread:$0]  (!%p3022_p11), %s3369_s1, 512, %s3015_s25, [#allocation6], %s2916_s11, %s2916_s11, %s2917_s12  }
  0x28   : > { %s2784_s27 = scalar_lea.hbm %s3370_s2, 512 }
  0x29   : > { %p2785_p2 = scmp.ne.s32.totalorder %s3370_s2, %s2784_s27  ;;  %p2791_p10 = scmp.lt.u32.totalorder %s2784_s27, %s3370_s2 }
  0x2b   : > { %p2787_p1 = pnand %p2785_p2, %p2758_p13 }
  0x2d   : > { %p2788_p6 = pneg %p2787_p1 }
  0x2f   : > { %p2793_p3 = pnand %p2791_p10, %p2788_p6 }
  0x31   : > { %2796 = shalt.err (!%p2793_p3)
}
  0x32   : > { %s2797_s25 = scalar_lea.vmem %s3026_s28, 512  ;;  %p2805_p12 = scmp.lt.s32.totalorder %s3026_s28, %s3026_s28 }
  0x33   : > { %p2798_p5 = scmp.ne.s32.totalorder %s3026_s28, %s2797_s25  ;;  %p2806_p0 = scmp.lt.s32.totalorder %s2797_s25, %s2797_s25 }
  0x35   : > { %p2800_p7 = pnand %p2798_p5, %p2758_p13  ;;  %p2807_p2 = por %p2806_p0, %p2805_p12 }
  0x37   : > { %p2801_p9 = pneg %p2800_p7 }
  0x39   : > { %p2808_p1 = pnand %p2807_p2, %p2801_p9 }
  0x3b   : > { %2811 = shalt.err (!%p2808_p1)
}
  0x3c   : > { %2647 = dma.hbm_to_vmem [thread:$0]  (!%p3022_p11), %s3370_s2, 512, %s3026_s28, [#allocation6], %s2916_s11, %s2916_s11, %s2917_s12  }
  0x3d   : > { %s3081_s9 = sadd.s32 1, %s2912_s18   ;;  %s28_s26 = sadd.s32 1, %s2908_s17 }
  0x3e   : > { %s25_s10 = ssub.s32 %s2912_s18, %s3081_s9  ;;  %p35_p13 = scmp.ne.s32.totalorder %s2908_s17, %s2904_s16 }
  0x3f   : > { %p26_p6 = scmp.eq.s32.totalorder %s25_s10, 0  ;;  %p36_p10 = scmp.eq.s32.totalorder %s2912_s18, 0 }
  0x40   : > { %p3380_p3 = scmp.eq.s32.totalorder %s2992_s19, 1  ;;  %p2658_p7 = scmp.lt.s32.totalorder %s2912_s18, 2 }
  0x41   : > { %s3097_s14 = scalar_select %p26_p6, %s2908_s17, %s28_s26  }
  0x42   : > { %p3091_p5 = por %p3380_p3, %p35_p13  ;;  %p37_p9 = por %p36_p10, %p35_p13 }
  0x43   : > { %s183_s20 = sand.u32 1, %s2908_s17   ;;  %s2387_s28 = sshll.u32 %s2912_s18, 7 }
  0x44   : > { %s3381_s13 = scalar_select %p3091_p5, 1, 0 }
  0x45   : > { %s2386_s24 = sshll.u32 %s183_s20, 3  ;;  %s3104_s27 = scalar_lea.hbm %s3368_s0, %s2387_s28 }
  0x46   : > { %s187_s29 = scalar_lea.vmem [#allocation2], %s2386_s24  ;;  %p3108_p11 = pnand %p2658_p7, %p37_p9 }
  0x47   : > { %s194_s30 = sshll.u32 %s187_s29, 4  ;;  %s184_s6 = scalar_lea.sflag [#allocation3], %s183_s20  ;;  %s3106_s30 = int_to_ptr.vmem [resolvable:$true] %s194_s30 }
  0x48   : > { %s2812_s25 = scalar_lea.hbm %s3104_s27, 128  ;;  %p2814_p0 = pneg %p3108_p11 }
  0x49   : > { %p2813_p12 = scmp.ne.s32.totalorder %s3104_s27, %s2812_s25  ;;  %s2817_s26 = scalar_lea.hbm %s3368_s0, 256 }
  0x4a   : > { %p2818_p13 = scmp.lt.u32.totalorder %s3104_s27, %s3368_s0  ;;  %p2819_p6 = scmp.lt.u32.totalorder %s2817_s26, %s2812_s25 }
  0x4b   : > { %p2815_p2 = pnand %p2814_p0, %p2813_p12  ;;  %p2821_p3 = scmp.lt.u32.totalorder %s2812_s25, %s3104_s27 }
  0x4c   : > { %p2820_p10 = por %p2819_p6, %p2818_p13 }
  0x4d   : > { %p2816_p1 = pneg %p2815_p2 }
  0x4e   : > { %p2822_p7 = por %p2821_p3, %p2820_p10 }
  0x50   : > { %p2823_p9 = pnand %p2822_p7, %p2816_p1 }
  0x52   : > { %2826 = shalt.err (!%p2823_p9)
}
  0x53   : > { %s2827_s20 = scalar_lea.vmem %s3106_s30, 128  ;;  %s2918_s28 = smov [#allocation2]  }
  0x54   : > { %p2828_p12 = scmp.ne.s32.totalorder %s3106_s30, %s2827_s20  ;;  %s2832_s11 = sshll.u32 %s2918_s28, 4  ;;  %s2833_s11 = int_to_ptr.vmem [resolvable:$false] %s2832_s11 }
  0x55   : > { %s2834_s12 = scalar_lea.vmem %s2833_s11, 256  ;;  %p2835_p4 = scmp.lt.s32.totalorder %s3106_s30, %s2833_s11 }
  0x56   : > { %p2830_p2 = pnand %p2828_p12, %p2814_p0  ;;  %p2836_p13 = scmp.lt.s32.totalorder %s2834_s12, %s2827_s20 }
  0x58   : > { %p2831_p5 = pneg %p2830_p2  ;;  %p2837_p6 = por %p2836_p13, %p2835_p4 }
  0x5a   : > { %p2838_p10 = pnand %p2837_p6, %p2831_p5 }
  0x5c   : > { %2841 = shalt.err (!%p2838_p10)
}
  0x5d   : > { %2651 = dma.hbm_to_vmem [thread:$0]  (!%p3108_p11), %s3104_s27, 128, %s3106_s30, %s184_s6  }
  0x5e   : > { %203 = sbr.rel (%p3011_p8) target bundleno = 4823 (0x12d7), region = 36  ;;  %s3140_s29 = sand.u32 (!%p3011_p8), 1, %s2904_s16  }
  0x5f   : > { %s2389_s25 = sshll.u32 (!%p3011_p8), %s3140_s29, 3  ;;  %s206_s7 = scalar_lea.sflag (!%p3011_p8), [#allocation3], %s3140_s29 }
  0x60   : > { %s209_s8 = scalar_lea.vmem (!%p3011_p8), [#allocation2], %s2389_s25  ;;  %p3383_p4 = scmp.ne.s32.totalorder (!%p3011_p8), %s3376_s21, 0 }
  0x65   : > { %2887 = dma.done.wait (%p3383_p4), %s206_s7, 128  }
  0x66   : > { %2889 = vsyncadd (%p3383_p4), %s206_s7, 4294967168  ;;  %p3384_p5 = scmp.eq.s32.totalorder %s2992_s19, 0 }
  0x68   : > { %2891 = dma.done.wait (%p3384_p5), [#allocation6], 1024   ;;  %p3385_p8 = pmov %p3384_p5 }
  0x69   : > { %v2919_v0 = vmov 0.0|0.0   ;;  %vm2920_vm0 = vmmov 0   ;;  %v2921_v1 = vmov 0.0   ;;  %v243_v2 = vld [vmem:[#allocation5] sm:$0xff]  ;;  %v244_v3 = vld [vmem:[#allocation5 + $0x8] sm:$0xff]  ;;  %v245_v4 = vld [vmem:[#allocation5 + $0x10] sm:$0xff] }
  0x6a   : > { %2893 = vsyncadd (%p3385_p8), [#allocation6], 4294966272  ;;  %2623 = vmatprep.subr.bf16.mxu0 %v2919_v0  ;;  %2500 = vmatprep.mubr.msk.f32.mxu0 %vm2920_vm0, %v2921_v1  ;;  %v2624_v5 = vpack.c.bf16 %v244_v3, %v243_v2  ;;  %v246_v6 = vld [vmem:[#allocation5 + $0x18] sm:$0xff]  ;;  %vm247_vm1 = vcmask 261120   ;;  %s2922_s21 = smov 124   ;;  %s2923_s23 = smov 96  }
  0x6b   : > { %2503 = vmatprep.subr.mxu1 %v2921_v1  ;;  %2505 = vmatprep.mubr.msk.f32.mxu1 %vm2920_vm0, %v2921_v1  ;;  %v2627_v7 = vpack.c.bf16 %v246_v6, %v245_v4  ;;  %v242_v8 = vld [vmem:[%s209_s8] sm:$0xff]  ;;  %s2924_s27 = smov 92   ;;  %vm328_vm2 = vcmask 31744   ;;  %vm404_vm3 = vcmask 64512   ;;  %s2925_s30 = smov 60   ;;  %v321_v32 = vld [vmem:[#allocation7] sm:$0xff] }
  0x6c   : > { %2625 = vmatpush3.bf16.msra.mxu0 %v2624_v5  ;;  %s2926_s5 = smov 64   ;;  %s2927_s6 = smov 88   ;;  %vm663_vm4 = vcmask 1043456   ;;  %v659_v33 = vrot.slane %v321_v32, 4  ;;  %v322_v5 = vld [vmem:[#allocation7 + $0x8] sm:$0xff] }
  0x6d   : > { %2626 = vmatprep.subr.bf16.mxu0 %v2919_v0  ;;  %s2928_s26 = smov 120   ;;  %s2929_s10 = smov 84   ;;  %v1220_v6 = vrot.slane %v322_v5, 4 }
  0x6e   : > { %s2930_s24 = smov 116   ;;  %s2931_s20 = smov 56  }
  0x6f   : > { %s2932_s28 = smov 52   ;;  %s2933_s11 = smov 112  }
  0x70   : > { %2628 = vmatpush3.bf16.msra.mxu0 %v2627_v7  ;;  %s2934_s12 = smov 80   ;;  %s2935_s7 = smov 76  }
  0x71   : > { %2513 = vmatprep.subr.mxu0 %v2921_v1  ;;  %s2936_s8 = smov 108   ;;  %p3386_p0 = scmp.ne.s32.totalorder %s3381_s13, 0 }
  0x73   : > { %2501 = vmatmul.mubr.msk.f32.vlgmr.msra.gmra.mrb[0].mxu0 %vm247_vm1, %v242_v8 }
  0x74   : > { %2515 = vmatprep.mubr.msk.f32.mxu0 %vm2920_vm0, %v2921_v1 }
 0x146   : > { %v3163_v9 = vpop.f32.mrb[0].mxu0 }
 0x147   : > { %492 = vrot.lane.b32.xlu1 %v3163_v9, %s2922_s21  ;;  %326 = vrot.lane.b32.xlu0 %v3163_v9, %s2923_s23  ;;  %v2502_v10 = vpop.f32.mrb[1].mxu0  ;;  %s2937_s21 = smov 48   ;;  %s2938_s23 = smov 44  }
 0x14b   : > { %494 = vrot.lane.b32.xlu0 %v3163_v9, %s2924_s27  ;;  %s2939_s27 = smov 104  }
 0x1b9   : > { %v327_v11 = vpop.permute.xlu0 %326  ;;  %v493_v13 = vpop.permute.xlu1 %492 }
 0x1ba   : > { %2504 = vmatpush3.xpose.msk.msra.mxu1 %vm328_vm2, %v327_v11 }
 0x1bb   : > { %2508 = vmatprep.subr.mxu1 %v2921_v1 }
 0x1bd   : > { %2506 = vmatmul.mubr.msk.f32.vlgmr.msra.gmra.mrb[0].mxu1 %vm328_vm2, %v3163_v9  ;;  %v495_v12 = vpop.permute.xlu0 %494 }
 0x1be   : > { %2514 = vmatpush3.xpose.msk.msra.mxu0 %vm328_vm2, %v495_v12  ;;  %2510 = vmatprep.mubr.msk.f32.mxu1 %vm2920_vm0, %v2921_v1 }
 0x1bf   : > { %2523 = vmatprep.subr.mxu0 %v2921_v1 }
 0x1c1   : > { %2516 = vmatmul.mubr.msk.f32.vlgmr.msra.gmra.mrb[2].mxu0 %vm328_vm2, %v493_v13 }
 0x1c2   : > { %2525 = vmatprep.mubr.msk.f32.mxu0 %vm2920_vm0, %v2921_v1  ;;  %2524 = vmatpush3.msk.msra.mxu0 %vm663_vm4, %v659_v33 }
 0x1c3   : > { %2533 = vmatprep.subr.mxu0 %v2921_v1 }
 0x290   : > { %v399_v14 = vpop.f32.mrb[0].mxu1 }
 0x291   : > { %v403_v15 = vmul.f32 0.5, %v399_v14  ;;  %v2507_v16 = vpop.f32.mrb[1].mxu1 }
 0x293   : > { %v405_v17 = vsel %vm404_vm3, %v403_v15, -inf }
 0x294   : > { %406 = vmax.xlane.f32.xlu1 %v405_v17  ;;  %v566_v18 = vpop.f32.mrb[2].mxu0 }
 0x295   : > { %v570_v19 = vmul.f32 0.5, %v566_v18  ;;  %v2517_v20 = vpop.f32.mrb[3].mxu0 }
 0x297   : > { %v571_v21 = vsel %vm404_vm3, %v570_v19, -inf }
 0x298   : > { %572 = vmax.xlane.f32.xlu0 %v571_v21 }
 0x321   : > { %v407_v22 = vpop.xlane.xlu1 %406 }
 0x322   : > { %v408_v23 = vsub.f32 %v403_v15, %v407_v22 }
 0x324   : > { %v409_v24 = vmul.f32 1.442695, %v408_v23 }
 0x325   : > { %v573_v25 = vpop.xlane.xlu0 %572 }
 0x326   : > { %2724 = vpow2.f32 %v409_v24  ;;  %v574_v26 = vsub.f32 %v570_v19, %v573_v25 }
 0x328   : > { %v575_v27 = vmul.f32 1.442695, %v574_v26 }
 0x32a   : > { %2726 = vpow2.f32 %v575_v27 }
 0x330   : > { %v2725_v28 = vpop.eup %2724 }
 0x331   : > { %v411_v29 = vsel %vm404_vm3, %v2725_v28, 0.0 }
 0x332   : > { %412 = vadd.xlane.f32.xlu0 %v411_v29 }
 0x334   : > { %v2727_v30 = vpop.eup %2726 }
 0x335   : > { %v577_v31 = vsel %vm404_vm3, %v2727_v30, 0.0 }
 0x336   : > { %578 = vadd.xlane.f32.xlu1 %v577_v31 }
 0x347   : > { %582 = vrot.lane.b32.xlu1 %v3163_v9, %s2925_s30  ;;  %s2940_s30 = smov 72  }
 0x348   : > { %416 = vrot.lane.b32.xlu0 %v3163_v9, %s2926_s5  ;;  %s2941_s5 = smov 68  }
 0x34b   : > { %813 = vrot.lane.b32.xlu1 %v3163_v9, %s2927_s6  ;;  %s2942_s6 = smov 100  }
 0x34c   : > { %811 = vrot.lane.b32.xlu0 %v3163_v9, %s2928_s26  ;;  %s2943_s26 = smov 40  }
 0x3bf   : > { %v413_v34 = vpop.xlane.xlu0 %412 }
 0x3c0   : > { %2728 = vrcp.f32 %v413_v34 }
 0x3c3   : > { %v579_v35 = vpop.xlane.xlu1 %578  ;;  %v417_v36 = vpop.permute.xlu0 %416 }
 0x3c4   : > { %2730 = vrcp.f32 %v579_v35  ;;  %2509 = vmatpush3.msra.mxu1 %v417_v36 }
 0x3c5   : > { %2518 = vmatprep.subr.mxu1 %v2921_v1 }
 0x3c7   : > { %v583_v39 = vpop.permute.xlu1 %582  ;;  %v812_v47 = vpop.permute.xlu0 %811 }
 0x3ca   : > { %v2729_v37 = vpop.eup %2728 }
 0x3cb   : > { %v415_v38 = vmul.f32 %v2729_v37, %v2725_v28  ;;  %v814_v45 = vpop.permute.xlu1 %813 }
 0x3cd   : > { %2511 = vmatmul.mubr.msk.f32.vlgmr.msra.gmra.mrb[2].mxu1 %vm404_vm3, %v415_v38 }
 0x3ce   : > { %v2731_v40 = vpop.eup %2730  ;;  %2519 = vmatpush3.msra.mxu1 %v583_v39  ;;  %2520 = vmatprep.mubr.msk.f32.mxu1 %vm2920_vm0, %v2921_v1 }
 0x3cf   : > { %v581_v41 = vmul.f32 %v2731_v40, %v2727_v30  ;;  %2528 = vmatprep.subr.mxu1 %v2921_v1 }
 0x3d1   : > { %2521 = vmatmul.mubr.msk.f32.vlgmr.msra.gmra.mrb[4].mxu1 %vm404_vm3, %v581_v41 }
 0x3d2   : > { %2529 = vmatpush3.msk.msra.mxu1 %vm663_vm4, %v321_v32  ;;  %2530 = vmatprep.mubr.msk.f32.mxu1 %vm2920_vm0, %v2921_v1 }
 0x3d3   : > { %2538 = vmatprep.subr.mxu1 %v2921_v1 }
 0x4a0   : > { %v488_v42 = vpop.f32.mrb[2].mxu1 }
 0x4a1   : > { %v2512_v43 = vpop.f32.mrb[3].mxu1  ;;  %2531 = vmatmul.mubr.msk.f32.vlgmr.msra.gmra.mrb[6].mxu1 %vm328_vm2, %v488_v42 }
 0x4a2   : > { %2540 = vmatprep.mubr.msk.f32.mxu1 %vm2920_vm0, %v2921_v1 }
 0x4a4   : > { %v654_v44 = vpop.f32.mrb[4].mxu1 }
 0x4a5   : > { %v2522_v46 = vpop.f32.mrb[5].mxu1  ;;  %2526 = vmatmul.mubr.msk.f32.vlgmr.msra.gmra.mrb[4].mxu0 %vm328_vm2, %v654_v44 }
 0x4a6   : > { %2534 = vmatpush3.xpose.msk.msra.mxu0 %vm328_vm2, %v814_v45  ;;  %2535 = vmatprep.mubr.msk.f32.mxu0 %vm2920_vm0, %v2921_v1 }
 0x4a7   : > { %2543 = vmatprep.subr.mxu0 %v2921_v1 }
 0x4a9   : > { %2536 = vmatmul.mubr.msk.f32.vlgmr.msra.gmra.mrb[6].mxu0 %vm328_vm2, %v812_v47 }
 0x4aa   : > { %2545 = vmatprep.mubr.msk.f32.mxu0 %vm2920_vm0, %v2921_v1  ;;  %2544 = vmatpush3.msk.msra.mxu0 %vm663_vm4, %v322_v5 }
 0x4ab   : > { %2553 = vmatprep.subr.mxu0 %v2921_v1 }
 0x574   : > { %v807_v48 = vpop.f32.mrb[6].mxu1 }
 0x575   : > { %v2532_v49 = vpop.f32.mrb[7].mxu1 }
 0x578   : > { %v732_v50 = vpop.f32.mrb[4].mxu0 }
 0x579   : > { %v3210_v51 = vadd.f32 %v807_v48, %v732_v50  ;;  %v2527_v52 = vpop.f32.mrb[5].mxu0  ;;  %v323_v48 = vld [vmem:[#allocation7 + $0x10] sm:$0xff] }
 0x57a   : > { %v1706_v49 = vrot.slane %v323_v48, 4 }
 0x57c   : > { %v885_v53 = vpop.f32.mrb[6].mxu0 }
 0x57d   : > { %v889_v54 = vmul.f32 0.5, %v885_v53  ;;  %v2537_v55 = vpop.f32.mrb[7].mxu0 }
 0x57f   : > { %v890_v56 = vsel %vm404_vm3, %v889_v54, -inf }
 0x580   : > { %891 = vmax.xlane.f32.xlu1 %v890_v56 }
 0x591   : > { %1056 = vrot.lane.b32.xlu1 %v3163_v9, %s2929_s10  ;;  %s2944_s10 = smov 36  }
 0x595   : > { %1054 = vrot.lane.b32.xlu1 %v3163_v9, %s2930_s24 }
 0x60d   : > { %v892_v57 = vpop.xlane.xlu1 %891 }
 0x60e   : > { %v893_v58 = vsub.f32 %v889_v54, %v892_v57 }
 0x610   : > { %v894_v59 = vmul.f32 1.442695, %v893_v58 }
 0x611   : > { %v1057_v2 = vpop.permute.xlu1 %1056 }
 0x612   : > { %2732 = vpow2.f32 %v894_v59 }
 0x615   : > { %v1055_v4 = vpop.permute.xlu1 %1054 }
 0x61c   : > { %v2733_v60 = vpop.eup %2732 }
 0x61d   : > { %v896_v61 = vsel %vm404_vm3, %v2733_v60, 0.0 }
 0x61e   : > { %897 = vadd.xlane.f32.xlu0 %v896_v61 }
 0x634   : > { %901 = vrot.lane.b32.xlu0 %v3163_v9, %s2931_s20 }
 0x6ab   : > { %v898_v62 = vpop.xlane.xlu0 %897 }
 0x6ac   : > { %2734 = vrcp.f32 %v898_v62 }
 0x6af   : > { %v902_v63 = vpop.permute.xlu0 %901 }
 0x6b0   : > { %2539 = vmatpush3.msra.mxu1 %v902_v63 }
 0x6b1   : > { %2548 = vmatprep.subr.mxu1 %v2921_v1 }
 0x6b6   : > { %v2735_v0 = vpop.eup %2734 }
 0x6b7   : > { %v900_v3 = vmul.f32 %v2735_v0, %v2733_v60 }
 0x6b9   : > { %2541 = vmatmul.mubr.msk.f32.vlgmr.msra.gmra.mrb[8].mxu1 %vm404_vm3, %v900_v3 }
 0x6ba   : > { %2549 = vmatpush3.xpose.msk.msra.mxu1 %vm328_vm2, %v1057_v2  ;;  %2550 = vmatprep.mubr.msk.f32.mxu1 %vm2920_vm0, %v2921_v1 }
 0x6bb   : > { %2558 = vmatprep.subr.mxu1 %v2921_v1 }
 0x6bd   : > { %2551 = vmatmul.mubr.msk.f32.vlgmr.msra.gmra.mrb[10].mxu1 %vm328_vm2, %v1055_v4 }
 0x6be   : > { %2560 = vmatprep.mubr.msk.f32.mxu1 %vm2920_vm0, %v2921_v1  ;;  %2559 = vmatpush3.msk.msra.mxu1 %vm663_vm4, %v1220_v6 }
 0x6bf   : > { %2568 = vmatprep.subr.mxu1 %v2921_v1 }
 0x78c   : > { %v973_v7 = vpop.f32.mrb[8].mxu1 }
 0x78d   : > { %v2542_v8 = vpop.f32.mrb[9].mxu1  ;;  %2546 = vmatmul.mubr.msk.f32.vlgmr.msra.gmra.mrb[8].mxu0 %vm328_vm2, %v973_v7 }
 0x78e   : > { %2555 = vmatprep.mubr.msk.f32.mxu0 %vm2920_vm0, %v2921_v1 }
 0x790   : > { %v1128_v10 = vpop.f32.mrb[10].mxu1 }
 0x791   : > { %v1132_v11 = vmul.f32 0.5, %v1128_v10  ;;  %v2552_v12 = vpop.f32.mrb[11].mxu1 }
 0x793   : > { %v1133_v13 = vsel %vm404_vm3, %v1132_v11, -inf }
 0x794   : > { %1134 = vmax.xlane.f32.xlu0 %v1133_v13 }
 0x7aa   : > { %1144 = vrot.lane.b32.xlu0 %v3163_v9, %s2932_s28  ;;  %s2436_s28 = sshll.u32 %s2992_s19, 7 }
 0x7ae   : > { %1297 = vrot.lane.b32.xlu0 %v3163_v9, %s2933_s11  ;;  %s241_s11 = scalar_lea.vmem [#allocation8], %s2389_s25  ;;  %s2945_s25 = smov [#allocation8]  }
 0x821   : > { %v1135_v14 = vpop.xlane.xlu0 %1134 }
 0x822   : > { %v1136_v15 = vsub.f32 %v1132_v11, %v1135_v14 }
 0x824   : > { %v1137_v16 = vmul.f32 1.442695, %v1136_v15 }
 0x825   : > { %v1145_v17 = vpop.permute.xlu0 %1144 }
 0x826   : > { %2736 = vpow2.f32 %v1137_v16  ;;  %2554 = vmatpush3.msra.mxu0 %v1145_v17 }
 0x827   : > { %2563 = vmatprep.subr.mxu0 %v2921_v1 }
 0x829   : > { %v1298_v27 = vpop.permute.xlu0 %1297 }
 0x830   : > { %v2737_v18 = vpop.eup %2736 }
 0x831   : > { %v1139_v19 = vsel %vm404_vm3, %v2737_v18, 0.0 }
 0x832   : > { %1140 = vadd.xlane.f32.xlu1 %v1139_v19 }
 0x843   : > { %1299 = vrot.lane.b32.xlu1 %v3163_v9, %s2934_s12  ;;  %s2292_s12 = sshll.u32 %s241_s11, 4  ;;  %s3325_s12 = int_to_ptr.vmem [resolvable:$true] %s2292_s12 }
 0x844   : > { %s2842_s19 = scalar_lea.vmem %s3325_s12, 128 }
 0x845   : > { %p2843_p11 = scmp.ne.s32.totalorder %s3325_s12, %s2842_s19 }
 0x847   : > { %p2844_p1 = pnand %p2843_p11, %p3386_p0 }
 0x849   : > { %p2845_p3 = pneg %p2844_p1 }
 0x860   : > { %v1049_v20 = vpop.f32.mrb[8].mxu0 }
 0x861   : > { %v1053_v21 = vadd.f32 %v1049_v20, %v3210_v51  ;;  %v2547_v22 = vpop.f32.mrb[9].mxu0 }
 0x8bf   : > { %v1141_v23 = vpop.xlane.xlu1 %1140 }
 0x8c0   : > { %2738 = vrcp.f32 %v1141_v23 }
 0x8c3   : > { %v1300_v26 = vpop.permute.xlu1 %1299 }
 0x8ca   : > { %v2739_v24 = vpop.eup %2738 }
 0x8cb   : > { %v1143_v25 = vmul.f32 %v2739_v24, %v2737_v18 }
 0x8cd   : > { %2556 = vmatmul.mubr.msk.f32.vlgmr.msra.gmra.mrb[10].mxu0 %vm404_vm3, %v1143_v25 }
 0x8ce   : > { %2564 = vmatpush3.xpose.msk.msra.mxu0 %vm328_vm2, %v1300_v26  ;;  %2565 = vmatprep.mubr.msk.f32.mxu0 %vm2920_vm0, %v2921_v1 }
 0x8cf   : > { %2573 = vmatprep.subr.mxu0 %v2921_v1 }
 0x8d1   : > { %2566 = vmatmul.mubr.msk.f32.vlgmr.msra.gmra.mrb[12].mxu0 %vm328_vm2, %v1298_v27 }
 0x8d2   : > { %2575 = vmatprep.mubr.msk.f32.mxu0 %vm2920_vm0, %v2921_v1  ;;  %2574 = vmatpush3.msk.msra.mxu0 %vm663_vm4, %v323_v48 }
 0x8d3   : > { %2583 = vmatprep.subr.mxu0 %v2921_v1 }
 0x9a0   : > { %v1216_v28 = vpop.f32.mrb[10].mxu0 }
 0x9a1   : > { %v2557_v29 = vpop.f32.mrb[11].mxu0  ;;  %2561 = vmatmul.mubr.msk.f32.vlgmr.msra.gmra.mrb[12].mxu1 %vm328_vm2, %v1216_v28  ;;  %v324_v28 = vld [vmem:[#allocation7 + $0x18] sm:$0xff] }
 0x9a2   : > { %2570 = vmatprep.mubr.msk.f32.mxu1 %vm2920_vm0, %v2921_v1  ;;  %v2192_v29 = vrot.slane %v324_v28, 4 }
 0x9a4   : > { %v1371_v30 = vpop.f32.mrb[12].mxu0 }
 0x9a5   : > { %v1375_v31 = vmul.f32 0.5, %v1371_v30  ;;  %v2567_v32 = vpop.f32.mrb[13].mxu0 }
 0x9a7   : > { %v1376_v33 = vsel %vm404_vm3, %v1375_v31, -inf }
 0x9a8   : > { %1377 = vmax.xlane.f32.xlu1 %v1376_v33 }
 0x9b9   : > { %1542 = vrot.lane.b32.xlu1 %v3163_v9, %s2935_s7 }
 0x9bd   : > { %1540 = vrot.lane.b32.xlu1 %v3163_v9, %s2936_s8 }
 0xa35   : > { %v1378_v34 = vpop.xlane.xlu1 %1377 }
 0xa36   : > { %v1379_v35 = vsub.f32 %v1375_v31, %v1378_v34 }
 0xa38   : > { %v1380_v36 = vmul.f32 1.442695, %v1379_v35 }
 0xa39   : > { %v1543_v45 = vpop.permute.xlu1 %1542 }
 0xa3a   : > { %2740 = vpow2.f32 %v1380_v36 }
 0xa3d   : > { %v1541_v47 = vpop.permute.xlu1 %1540 }
 0xa44   : > { %v2741_v37 = vpop.eup %2740 }
 0xa45   : > { %v1382_v38 = vsel %vm404_vm3, %v2741_v37, 0.0 }
 0xa46   : > { %1383 = vadd.xlane.f32.xlu0 %v1382_v38 }
 0xa5c   : > { %1387 = vrot.lane.b32.xlu0 %v3163_v9, %s2937_s21  ;;  %s3323_s21 = scalar_lea.hbm %s3372_s4, %s2436_s28 }
 0xa74   : > { %v1292_v39 = vpop.f32.mrb[12].mxu1 }
 0xa75   : > { %v1296_v40 = vadd.f32 %v1292_v39, %v1053_v21  ;;  %v2562_v41 = vpop.f32.mrb[13].mxu1 }
 0xad3   : > { %v1384_v42 = vpop.xlane.xlu0 %1383 }
 0xad4   : > { %2742 = vrcp.f32 %v1384_v42 }
 0xad7   : > { %v1388_v43 = vpop.permute.xlu0 %1387 }
 0xad8   : > { %2569 = vmatpush3.msra.mxu1 %v1388_v43 }
 0xad9   : > { %2578 = vmatprep.subr.mxu1 %v2921_v1 }
 0xade   : > { %v2743_v44 = vpop.eup %2742 }
 0xadf   : > { %v1386_v46 = vmul.f32 %v2743_v44, %v2741_v37 }
 0xae1   : > { %2571 = vmatmul.mubr.msk.f32.vlgmr.msra.gmra.mrb[14].mxu1 %vm404_vm3, %v1386_v46 }
 0xae2   : > { %2579 = vmatpush3.xpose.msk.msra.mxu1 %vm328_vm2, %v1543_v45  ;;  %2580 = vmatprep.mubr.msk.f32.mxu1 %vm2920_vm0, %v2921_v1 }
 0xae3   : > { %2588 = vmatprep.subr.mxu1 %v2921_v1 }
 0xae5   : > { %2581 = vmatmul.mubr.msk.f32.vlgmr.msra.gmra.mrb[16].mxu1 %vm328_vm2, %v1541_v47 }
 0xae6   : > { %2590 = vmatprep.mubr.msk.f32.mxu1 %vm2920_vm0, %v2921_v1  ;;  %2589 = vmatpush3.msk.msra.mxu1 %vm663_vm4, %v1706_v49  ;;  %v2434_v49 = vld [vmem:[%s3371_s3] ss:$0 sm:$0xff] }
 0xae7   : > { %2598 = vmatprep.subr.mxu1 %v2921_v1 }
 0xbb4   : > { %v1459_v50 = vpop.f32.mrb[14].mxu1 }
 0xbb5   : > { %v2572_v51 = vpop.f32.mrb[15].mxu1  ;;  %2576 = vmatmul.mubr.msk.f32.vlgmr.msra.gmra.mrb[14].mxu0 %vm328_vm2, %v1459_v50 }
 0xbb6   : > { %2585 = vmatprep.mubr.msk.f32.mxu0 %vm2920_vm0, %v2921_v1 }
 0xbb8   : > { %v1614_v52 = vpop.f32.mrb[16].mxu1 }
 0xbb9   : > { %v1618_v53 = vmul.f32 0.5, %v1614_v52  ;;  %v2582_v54 = vpop.f32.mrb[17].mxu1 }
 0xbbb   : > { %v1619_v55 = vsel %vm404_vm3, %v1618_v53, -inf }
 0xbbc   : > { %1620 = vmax.xlane.f32.xlu0 %v1619_v55 }
 0xbd2   : > { %1630 = vrot.lane.b32.xlu0 %v3163_v9, %s2938_s23  ;;  %s2279_s23 = scalar_lea.sflag [#allocation4], %s3140_s29 }
 0xbd6   : > { %1783 = vrot.lane.b32.xlu0 %v3163_v9, %s2939_s27  ;;  %s2846_s27 = sshll.u32 %s2945_s25, 4  ;;  %s2847_s27 = int_to_ptr.vmem [resolvable:$false] %s2846_s27 }
 0xbd7   : > { %p2849_p7 = scmp.lt.s32.totalorder %s3325_s12, %s2847_s27 }
 0xc49   : > { %v1621_v56 = vpop.xlane.xlu0 %1620 }
 0xc4a   : > { %v1622_v57 = vsub.f32 %v1618_v53, %v1621_v56 }
 0xc4c   : > { %v1623_v58 = vmul.f32 1.442695, %v1622_v57 }
 0xc4d   : > { %v1631_v59 = vpop.permute.xlu0 %1630 }
 0xc4e   : > { %2744 = vpow2.f32 %v1623_v58  ;;  %2584 = vmatpush3.msra.mxu0 %v1631_v59 }
 0xc4f   : > { %2593 = vmatprep.subr.mxu0 %v2921_v1 }
 0xc51   : > { %v1784_v6 = vpop.permute.xlu0 %1783 }
 0xc58   : > { %v2745_v60 = vpop.eup %2744 }
 0xc59   : > { %v1625_v61 = vsel %vm404_vm3, %v2745_v60, 0.0 }
 0xc5a   : > { %1626 = vadd.xlane.f32.xlu1 %v1625_v61 }
 0xc6b   : > { %1785 = vrot.lane.b32.xlu1 %v3163_v9, %s2940_s30  ;;  %s2848_s30 = scalar_lea.vmem %s2847_s27, 256 }
 0xc6c   : > { %p2850_p9 = scmp.lt.s32.totalorder %s2848_s30, %s2842_s19 }
 0xc6e   : > { %p2851_p12 = por %p2850_p9, %p2849_p7 }
 0xc70   : > { %p2852_p2 = pnand %p2851_p12, %p2845_p3 }
 0xc88   : > { %v1535_v62 = vpop.f32.mrb[14].mxu0 }
 0xc89   : > { %v1539_v63 = vadd.f32 %v1535_v62, %v1296_v40  ;;  %v2577_v0 = vpop.f32.mrb[15].mxu0 }
 0xce7   : > { %v1627_v2 = vpop.xlane.xlu1 %1626 }
 0xce8   : > { %2746 = vrcp.f32 %v1627_v2 }
 0xceb   : > { %v1786_v5 = vpop.permute.xlu1 %1785 }
 0xcf2   : > { %v2747_v3 = vpop.eup %2746 }
 0xcf3   : > { %v1629_v4 = vmul.f32 %v2747_v3, %v2745_v60 }
 0xcf5   : > { %2586 = vmatmul.mubr.msk.f32.vlgmr.msra.gmra.mrb[16].mxu0 %vm404_vm3, %v1629_v4 }
 0xcf6   : > { %2594 = vmatpush3.xpose.msk.msra.mxu0 %vm328_vm2, %v1786_v5  ;;  %2595 = vmatprep.mubr.msk.f32.mxu0 %vm2920_vm0, %v2921_v1 }
 0xcf7   : > { %2603 = vmatprep.subr.mxu0 %v2921_v1 }
 0xcf9   : > { %2596 = vmatmul.mubr.msk.f32.vlgmr.msra.gmra.mrb[18].mxu0 %vm328_vm2, %v1784_v6 }
 0xcfa   : > { %2605 = vmatprep.mubr.msk.f32.mxu0 %vm2920_vm0, %v2921_v1  ;;  %2604 = vmatpush3.msk.msra.mxu0 %vm663_vm4, %v324_v28 }
 0xcfb   : > { %2613 = vmatprep.subr.mxu0 %v2921_v1 }
 0xdc8   : > { %v1702_v7 = vpop.f32.mrb[16].mxu0 }
 0xdc9   : > { %v2587_v8 = vpop.f32.mrb[17].mxu0  ;;  %2591 = vmatmul.mubr.msk.f32.vlgmr.msra.gmra.mrb[18].mxu1 %vm328_vm2, %v1702_v7 }
 0xdca   : > { %2600 = vmatprep.mubr.msk.f32.mxu1 %vm2920_vm0, %v2921_v1 }
 0xdcc   : > { %v1857_v10 = vpop.f32.mrb[18].mxu0 }
 0xdcd   : > { %v1861_v11 = vmul.f32 0.5, %v1857_v10  ;;  %v2597_v12 = vpop.f32.mrb[19].mxu0 }
 0xdcf   : > { %v1862_v13 = vsel %vm404_vm3, %v1861_v11, -inf }
 0xdd0   : > { %1863 = vmax.xlane.f32.xlu1 %v1862_v13 }
 0xde1   : > { %2028 = vrot.lane.b32.xlu1 %v3163_v9, %s2941_s5 }
 0xde5   : > { %2026 = vrot.lane.b32.xlu1 %v3163_v9, %s2942_s6 }
 0xe5d   : > { %v1864_v14 = vpop.xlane.xlu1 %1863 }
 0xe5e   : > { %v1865_v15 = vsub.f32 %v1861_v11, %v1864_v14 }
 0xe60   : > { %v1866_v16 = vmul.f32 1.442695, %v1865_v15 }
 0xe61   : > { %v2029_v25 = vpop.permute.xlu1 %2028 }
 0xe62   : > { %2748 = vpow2.f32 %v1866_v16 }
 0xe65   : > { %v2027_v27 = vpop.permute.xlu1 %2026 }
 0xe6c   : > { %v2749_v17 = vpop.eup %2748 }
 0xe6d   : > { %v1868_v18 = vsel %vm404_vm3, %v2749_v17, 0.0 }
 0xe6e   : > { %1869 = vadd.xlane.f32.xlu0 %v1868_v18 }
 0xe84   : > { %1873 = vrot.lane.b32.xlu0 %v3163_v9, %s2943_s26 }
 0xe9c   : > { %v1778_v19 = vpop.f32.mrb[18].mxu1 }
 0xe9d   : > { %v1782_v20 = vadd.f32 %v1778_v19, %v1539_v63  ;;  %v2592_v21 = vpop.f32.mrb[19].mxu1 }
 0xefb   : > { %v1870_v22 = vpop.xlane.xlu0 %1869 }
 0xefc   : > { %2750 = vrcp.f32 %v1870_v22 }
 0xeff   : > { %v1874_v23 = vpop.permute.xlu0 %1873 }
 0xf00   : > { %2599 = vmatpush3.msra.mxu1 %v1874_v23 }
 0xf01   : > { %2608 = vmatprep.subr.mxu1 %v2921_v1 }
 0xf06   : > { %v2751_v24 = vpop.eup %2750 }
 0xf07   : > { %v1872_v26 = vmul.f32 %v2751_v24, %v2749_v17 }
 0xf09   : > { %2601 = vmatmul.mubr.msk.f32.vlgmr.msra.gmra.mrb[20].mxu1 %vm404_vm3, %v1872_v26 }
 0xf0a   : > { %2609 = vmatpush3.xpose.msk.msra.mxu1 %vm328_vm2, %v2029_v25  ;;  %2610 = vmatprep.mubr.msk.f32.mxu1 %vm2920_vm0, %v2921_v1 }
 0xf0b   : > { %2618 = vmatprep.subr.mxu1 %v2921_v1 }
 0xf0d   : > { %2611 = vmatmul.mubr.msk.f32.vlgmr.msra.gmra.mrb[22].mxu1 %vm328_vm2, %v2027_v27 }
 0xf0e   : > { %2620 = vmatprep.mubr.msk.f32.mxu1 %vm2920_vm0, %v2921_v1  ;;  %2619 = vmatpush3.msk.msra.mxu1 %vm663_vm4, %v2192_v29 }
 0xfdc   : > { %v1945_v30 = vpop.f32.mrb[20].mxu1 }
 0xfdd   : > { %v2602_v31 = vpop.f32.mrb[21].mxu1  ;;  %2606 = vmatmul.mubr.msk.f32.vlgmr.msra.gmra.mrb[20].mxu0 %vm328_vm2, %v1945_v30 }
 0xfde   : > { %2615 = vmatprep.mubr.msk.f32.mxu0 %vm2920_vm0, %v2921_v1 }
 0xfe0   : > { %v2100_v32 = vpop.f32.mrb[22].mxu1 }
 0xfe1   : > { %v2104_v33 = vmul.f32 0.5, %v2100_v32  ;;  %v2612_v34 = vpop.f32.mrb[23].mxu1 }
 0xfe3   : > { %v2105_v35 = vsel %vm404_vm3, %v2104_v33, -inf }
 0xfe4   : > { %2106 = vmax.xlane.f32.xlu0 %v2105_v35 }
 0xffa   : > { %2116 = vrot.lane.b32.xlu0 %v3163_v9, %s2944_s10 }
0x1071   : > { %v2107_v36 = vpop.xlane.xlu0 %2106 }
0x1072   : > { %v2108_v37 = vsub.f32 %v2104_v33, %v2107_v36 }
0x1074   : > { %v2109_v38 = vmul.f32 1.442695, %v2108_v37 }
0x1075   : > { %v2117_v39 = vpop.permute.xlu0 %2116 }
0x1076   : > { %2752 = vpow2.f32 %v2109_v38  ;;  %2614 = vmatpush3.msra.mxu0 %v2117_v39 }
0x1080   : > { %v2753_v40 = vpop.eup %2752 }
0x1081   : > { %v2111_v41 = vsel %vm404_vm3, %v2753_v40, 0.0 }
0x1082   : > { %2112 = vadd.xlane.f32.xlu1 %v2111_v41 }
0x10b0   : > { %v2021_v1 = vpop.f32.mrb[20].mxu0 }
0x10b1   : > { %v2025_v42 = vadd.f32 %v2021_v1, %v1782_v20  ;;  %v2607_v43 = vpop.f32.mrb[21].mxu0 }
0x110f   : > { %v2113_v44 = vpop.xlane.xlu1 %2112 }
0x1110   : > { %2754 = vrcp.f32 %v2113_v44 }
0x111a   : > { %v2755_v45 = vpop.eup %2754 }
0x111b   : > { %v2115_v46 = vmul.f32 %v2755_v45, %v2753_v40 }
0x111d   : > { %2616 = vmatmul.mubr.msk.f32.vlgmr.msra.gmra.mrb[22].mxu0 %vm404_vm3, %v2115_v46 }
0x11f0   : > { %v2188_v9 = vpop.f32.mrb[22].mxu0 }
0x11f1   : > { %v2617_v47 = vpop.f32.mrb[23].mxu0  ;;  %2621 = vmatmul.mubr.msk.f32.vlgmr.msra.gmra.mrb[24].mxu1 %vm328_vm2, %v2188_v9 }
0x12c4   : > { %v2264_v48 = vpop.f32.mrb[24].mxu1 }
0x12c5   : > { %v2268_v50 = vadd.f32 %v2264_v48, %v2025_v42  ;;  %v2622_v51 = vpop.f32.mrb[25].mxu1 }
0x12c7   : > { %v2276_v52 = vadd.f32 %v2434_v49, %v2268_v50 }
0x12c9   : > { %2277 = vst.msk [vmem:[%s241_s11] sm:$0xff] %vm247_vm1, %v2276_v52 }
0x12ca   : > { %2855 = shalt.err (!%p2852_p2)
}
0x12cb   : > { %s2856_s29 = scalar_lea.hbm %s3323_s21, 128  ;;  %s2860_s26 = scalar_lea.hbm %s3372_s4, 256 }
0x12cc   : > { %p2857_p13 = scmp.ne.s32.totalorder %s3323_s21, %s2856_s29  ;;  %p2861_p4 = scmp.lt.u32.totalorder %s3323_s21, %s3372_s4 }
0x12cd   : > { %p2862_p5 = scmp.lt.u32.totalorder %s2860_s26, %s2856_s29  ;;  %p2864_p11 = scmp.lt.u32.totalorder %s2856_s29, %s3323_s21 }
0x12ce   : > { %p2858_p6 = pnand %p2857_p13, %p3386_p0 }
0x12cf   : > { %p2863_p8 = por %p2862_p5, %p2861_p4 }
0x12d0   : > { %p2859_p10 = pneg %p2858_p6 }
0x12d1   : > { %p2865_p1 = por %p2864_p11, %p2863_p8 }
0x12d3   : > { %p2866_p3 = pnand %p2865_p1, %p2859_p10 }
0x12d5   : > { %2869 = shalt.err (!%p2866_p3)
}
0x12d6   : > { %2639 = dma.vmem_to_hbm [thread:$0]  (%p3386_p0), %s3325_s12, 128, %s3323_s21, %s2279_s23  }
0x12d7 PF: > { %s2304_s20 = sand.u32 1, %s2900_s15   ;;  %p3387_p7 = scmp.ne.s32.totalorder %s3377_s22, 0 }
0x12d8   : > { %p3388_p9 = scmp.ge.s32.totalorder %s2912_s18, 2  ;;  %s2305_s28 = scalar_lea.sflag [#allocation4], %s2304_s20 }
0x12da   : > { %p2653_p12 = pnand %p3388_p9, %p3387_p7 }
0x12dc   : > { %2895 = dma.done.wait (!%p2653_p12), %s2305_s28, 128  }
0x12dd   : > { %2897 = vsyncadd (!%p2653_p12), %s2305_s28, 4294967168  ;;  %p18_p2 = scmp.ge.s32.totalorder %s3081_s9, 4   ;;  %s3389_s15 = smov %s2904_s16 }
0x12de   : > { %s3390_s16 = smov %s2908_s17  ;;  %s3391_s17 = smov %s3097_s14 }
0x12df   : > { %s3392_s18 = smov %s3081_s9  ;;  %20 = sbr.rel (!%p18_p2) target bundleno = 6 (0x6), region = 89 }
0x12e6   :  { %2310 = vsyncpa [#allocation3], 1 }
0x12e7   :  { %2312 = vsyncpa [#allocation3 + $0x1], 1 }
0x12e8   :  { %2313 = vsyncpa [#allocation6], 1 }
0x12e9   :  { %2314 = vsyncpa [#allocation4], 1 }
0x12ea   :  { %2316 = vsyncpa [#allocation4 + $0x1], 1 }

</bundles_post_ra>
